<compile_context>
chip_gen: v6e
topology: v6e:2x2x1
jax: 0.10.0
libtpu: 0.0.40
codegen_flags: <defaults>
</compile_context>

<pallas_src>
import functools

import jax
import jax.numpy as jnp
from jax import lax
from jax.experimental import pallas as pl
from jax.experimental.pallas import tpu as pltpu

LANE = 128  # padded channel width (TPU lane count)


def dense_block_kernel(x_ref, w_ref, out_ref, feat_ref, *,
                       seq_len, c_in, k, num_module, compute_dtype):
    """One grid step: `batch_per_step` whole sequences flattened onto sublanes.

    x_ref    : (rows, c_in)                input features, rows = batch_per_step * seq_len
    w_ref    : (LANE, num_module * 3 * k)  packed per-layer [center|minus|plus] weights
    out_ref  : (rows, LANE)                lane-padded ReLU'd dense feature output
    feat_ref : (rows, LANE) VMEM scratch   running dense feature map (+ constant-1 bias lane)
    """
    rows = feat_ref.shape[0]

    # --- init scratch: [ x | 0 ... 0 | 1.0 (bias lane) ] -----------------------------
    feat_ref[...] = jnp.zeros_like(feat_ref)
    feat_ref[:, 0:c_in] = x_ref[...]
    feat_ref[:, LANE - 1:LANE] = jnp.ones((rows, 1), jnp.float32)

    # --- per-row sequence-position masks (shared by all layers) ----------------------
    pos = lax.broadcasted_iota(jnp.int32, (rows, k), 0) % seq_len
    not_first = pos != 0                 # row has a valid left  neighbour (x[l-1])
    not_last = pos != (seq_len - 1)      # row has a valid right neighbour (x[l+1])

    zrow = jnp.zeros((1, k), jnp.float32)
    for i in range(num_module):
        w_i = w_ref[:, i * 3 * k:(i + 1) * 3 * k]            # (LANE, 3k)
        feat = feat_ref[...]                                 # (rows, LANE)
        z = jnp.dot(feat.astype(compute_dtype), w_i.astype(compute_dtype),
                    preferred_element_type=jnp.float32)      # one fused MXU matmul / layer
        z_c = z[:, 0:k]            # center tap (+ bias via the constant-1 lane)
        z_m = z[:, k:2 * k]        # tap that multiplies x[l-1]
        z_p = z[:, 2 * k:3 * k]    # tap that multiplies x[l+1]
        # Shift the small (rows, k) results by +/-1 row; mask sequence boundaries
        # (covers both the conv zero-padding and batch-boundary rows in the flat block).
        y_m = jnp.where(not_first,
                        jnp.concatenate([zrow, z_m[:-1, :]], axis=0), 0.0)
        y_p = jnp.where(not_last,
                        jnp.concatenate([z_p[1:, :], zrow], axis=0), 0.0)
        y = z_c + y_m + y_p
        feat_ref[:, c_in + i * k: c_in + (i + 1) * k] = y    # dense connection

    out_ref[...] = jnp.maximum(feat_ref[...], 0.0)           # final ReLU, full-width store


def dense_block_pallas(x_ncl, weights, biases, *,
                       batch_per_step=None, compute_dtype=jnp.float32):
    """x_ncl: (N, C_in, L) f32.  weights[i]: (K, C_in + K*i, 3) (PyTorch Conv1d layout).
    biases[i]: (K,).  Returns (N, C_in + K*num_module, L) f32."""
    N, C_in, L = x_ncl.shape
    K = weights[0].shape[0]
    num_module = len(weights)
    C_out = C_in + K * num_module
    assert C_out < LANE, "channel growth must fit in one 128-lane tile (plus bias lane)"

    # Batches per grid step: fill sublanes, but keep >=2 grid steps when possible so the
    # "parallel" axis can shard across v7x's two TensorCores.
    if batch_per_step is None:
        batch_per_step = max(1, min(max(1, N // 2), max(1, 512 // L)))
        while N % batch_per_step:
            batch_per_step -= 1
    assert N % batch_per_step == 0
    rows = batch_per_step * L
    assert rows % 8 == 0 or rows == N * L, "block sublane count must be a multiple of 8"

    # NCL -> (N*L, C_in): channels on lanes, (batch, position) flattened onto sublanes.
    x_rows = jnp.transpose(x_ncl, (0, 2, 1)).reshape(N * L, C_in)

    # Pack all conv weights into a single (LANE, num_module*3K) slab.
    # Layer i occupies lane block [i*3K, (i+1)*3K) as [W_center | W_minus | W_plus],
    # zero-padded past that layer's input-channel count; the conv bias is folded into
    # W_center's row LANE-1, which multiplies the constant-1.0 bias feature lane.
    slabs = []
    for i, (w, b) in enumerate(zip(weights, biases)):
        c_i = C_in + K * i
        wc = jnp.zeros((LANE, K), jnp.float32).at[:c_i].set(w[:, :, 1].T)
        wc = wc.at[LANE - 1].set(b.reshape(K))
        wm = jnp.zeros((LANE, K), jnp.float32).at[:c_i].set(w[:, :, 0].T)
        wp = jnp.zeros((LANE, K), jnp.float32).at[:c_i].set(w[:, :, 2].T)
        slabs.append(jnp.concatenate([wc, wm, wp], axis=1))
    w_slab = jnp.concatenate(slabs, axis=1)  # (LANE, num_module*3K)

    grid = (N // batch_per_step,)
    kernel = functools.partial(dense_block_kernel, seq_len=L, c_in=C_in, k=K,
                               num_module=num_module, compute_dtype=compute_dtype)

    out_padded = pl.pallas_call(
        kernel,
        out_shape=jax.ShapeDtypeStruct((N * L, LANE), jnp.float32),
        grid_spec=pltpu.PrefetchScalarGridSpec(
            num_scalar_prefetch=0,
            grid=grid,
            in_specs=[
                pl.BlockSpec((rows, C_in), lambda g: (g, 0)),
                pl.BlockSpec((LANE, w_slab.shape[1]), lambda g: (0, 0)),
            ],
            out_specs=pl.BlockSpec((rows, LANE), lambda g: (g, 0)),
            scratch_shapes=[pltpu.VMEM((rows, LANE), jnp.float32)],
        ),
        compiler_params=pltpu.CompilerParams(
            dimension_semantics=("parallel",)),
    )(x_rows, w_slab)

    out = out_padded[:, :C_out].reshape(N, L, C_out)
    return jnp.transpose(out, (0, 2, 1))  # back to (N, C_out, L)


def dense_block_reference(x_ncl, weights, biases):
    """Pure-JAX reference using lax.conv (PyTorch NCL semantics)."""
    X = x_ncl
    for w, b in zip(weights, biases):
        Y = lax.conv_general_dilated(
            X, w, window_strides=(1,), padding=((1, 1),),
            dimension_numbers=("NCH", "OIH", "NCH"))
        Y = Y + b.reshape(1, -1, 1)
        X = jnp.concatenate([X, Y], axis=1)
    return jnp.maximum(X, 0.0)


if __name__ == "__main__":
    # Small, Conv1d-consistent shapes: batch=2, in_channel=4, growth k=4, seq length L=16.
    N, C_in, L, K, NUM_MODULE = 2, 4, 16, 4, 4

    key = jax.random.PRNGKey(0)
    key, kx = jax.random.split(key)
    x = jax.random.normal(kx, (N, C_in, L), dtype=jnp.float32)

    # Deterministic parameter init (PyTorch Conv1d weight layout: (out, in, kernel)).
    weights, biases = [], []
    for i in range(NUM_MODULE):
        cin_i = C_in + K * i
        key, kw, kb = jax.random.split(key, 3)
        bound = 1.0 / jnp.sqrt(jnp.float32(cin_i * 3.0))
        weights.append(jax.random.uniform(kw, (K, cin_i, 3), jnp.float32, -bound, bound))
        biases.append(jax.random.uniform(kb, (K,), jnp.float32, -bound, bound))

    out = dense_block_pallas(x, weights, biases)   # f32 path (use compute_dtype=jnp.bfloat16 on v6e/v7x)
    out = jax.block_until_ready(out)

    ref = dense_block_reference(x, weights, biases)
    assert out.shape == (N, C_in + K * NUM_MODULE, L)
    assert jnp.allclose(out, ref, atol=1e-5, rtol=1e-5), "mismatch vs reference"

    print("KERNEL_OK")
</pallas_src>

<mosaic_0001>
module attributes {stable_mosaic.version = 11 : i64} {
  func.func @dense_block_kernel(%arg0: i32, %arg1: memref<16x4xf32, #tpu.memory_space<vmem>>, %arg2: memref<128x48xf32, #tpu.memory_space<vmem>>, %arg3: memref<16x128xf32, #tpu.memory_space<vmem>>, %arg4: memref<16x128xf32, #tpu.memory_space<vmem>>) attributes {dimension_semantics = [#tpu.dimension_semantics<parallel>], iteration_bounds = array<i64: 2>, scalar_prefetch = 0 : i64, scratch_operands = 1 : i64, tpu.core_type = #tpu.core_type<tc>, window_params = [{transform_indices = @transform_0, window_bounds = array<i64: 16, 4>}, {pipeline_mode = #tpu.pipeline_mode<synchronous>, transform_indices = @transform_1, window_bounds = array<i64: 128, 48>}, {transform_indices = @transform_2, window_bounds = array<i64: 16, 128>}]} {
    %cst = arith.constant 0.000000e+00 : f32
    %0 = vector.broadcast %cst : f32 to vector<16x128xf32>
    %c0 = arith.constant 0 : index
    %c0_0 = arith.constant 0 : index
    %1 = vector.load %arg4[%c0, %c0_0] : memref<16x128xf32, #tpu.memory_space<vmem>>, vector<16x128xf32>
    tpu.vector_store %arg4[%c0, %c0_0], %0 {strides = array<i32>} : memref<16x128xf32, #tpu.memory_space<vmem>>, vector<16x128xf32>,
    %c0_1 = arith.constant 0 : index
    %c0_2 = arith.constant 0 : index
    %2 = vector.load %arg1[%c0_1, %c0_2] : memref<16x4xf32, #tpu.memory_space<vmem>>, vector<16x4xf32>
    %c0_3 = arith.constant 0 : index
    %c0_4 = arith.constant 0 : index
    %3 = vector.load %arg4[%c0_3, %c0_4] : memref<16x128xf32, #tpu.memory_space<vmem>>, vector<16x4xf32>
    tpu.vector_store %arg4[%c0_3, %c0_4], %2 {strides = array<i32>} : memref<16x128xf32, #tpu.memory_space<vmem>>, vector<16x4xf32>,
    %cst_5 = arith.constant 1.000000e+00 : f32
    %4 = vector.broadcast %cst_5 : f32 to vector<16x1xf32>
    %c0_6 = arith.constant 0 : index
    %c127 = arith.constant 127 : index
    %5 = vector.load %arg4[%c0_6, %c127] : memref<16x128xf32, #tpu.memory_space<vmem>>, vector<16x1xf32>
    tpu.vector_store %arg4[%c0_6, %c127], %4 {strides = array<i32>} : memref<16x128xf32, #tpu.memory_space<vmem>>, vector<16x1xf32>,
    %6 = tpu.iota {dimensions = array<i32: 0>} : vector<16x4xi32>
    %c16_i32 = arith.constant 16 : i32
    %c0_i32 = arith.constant 0 : i32
    %7 = arith.cmpi eq, %c16_i32, %c0_i32 : i32
    %c1_i32 = arith.constant 1 : i32
    %8 = arith.select %7, %c1_i32, %c16_i32 : i32
    %9 = vector.broadcast %8 : i32 to vector<16x4xi32>
    %10 = arith.remsi %6, %9 : vector<16x4xi32>
    %c0_i32_7 = arith.constant 0 : i32
    %11 = vector.broadcast %c0_i32_7 : i32 to vector<16x4xi32>
    %12 = arith.cmpi ne, %10, %11 : vector<16x4xi32>
    %c0_i32_8 = arith.constant 0 : i32
    %13 = vector.broadcast %c0_i32_8 : i32 to vector<16x4xi32>
    %14 = arith.cmpi slt, %10, %13 : vector<16x4xi32>
    %c0_i32_9 = arith.constant 0 : i32
    %15 = arith.cmpi slt, %8, %c0_i32_9 : i32
    %16 = vector.broadcast %15 : i1 to vector<16x4xi1>
    %17 = vector.broadcast %16 : vector<16x4xi1> to vector<16x4xi1>
    %18 = arith.xori %14, %17 : vector<16x4xi1>
    %19 = arith.andi %18, %12 : vector<16x4xi1>
    %20 = vector.broadcast %8 : i32 to vector<16x4xi32>
    %21 = arith.addi %10, %20 : vector<16x4xi32>
    %22 = arith.select %19, %21, %10 : vector<16x4xi1>, vector<16x4xi32>
    %c0_i32_10 = arith.constant 0 : i32
    %23 = vector.broadcast %c0_i32_10 : i32 to vector<16x4xi32>
    %24 = arith.cmpi ne, %22, %23 : vector<16x4xi32>
    %c15_i32 = arith.constant 15 : i32
    %25 = vector.broadcast %c15_i32 : i32 to vector<16x4xi32>
    %26 = arith.cmpi ne, %22, %25 : vector<16x4xi32>
    %cst_11 = arith.constant 0.000000e+00 : f32
    %27 = vector.broadcast %cst_11 : f32 to vector<1x4xf32>
    %c0_12 = arith.constant 0 : index
    %c0_13 = arith.constant 0 : index
    %28 = vector.load %arg2[%c0_12, %c0_13] : memref<128x48xf32, #tpu.memory_space<vmem>>, vector<128x12xf32>
    %c0_14 = arith.constant 0 : index
    %c0_15 = arith.constant 0 : index
    %29 = vector.load %arg4[%c0_14, %c0_15] : memref<16x128xf32, #tpu.memory_space<vmem>>, vector<16x128xf32>
    %cst_16 = arith.constant dense<0.000000e+00> : vector<16x12xf32>
    %30 = tpu.matmul %29, %28, %cst_16 {dimension_numbers = #tpu.dot_dimension_numbers<[1], [0], [0], [1], [0, 0, 1, 1], [], []>} : vector<16x128xf32>, vector<128x12xf32>, vector<16x12xf32> -> vector<16x12xf32>
    %31 = vector.extract_strided_slice %30 {offsets = [0, 0], sizes = [16, 4], strides = [1, 1]} : vector<16x12xf32> to vector<16x4xf32>
    %32 = vector.extract_strided_slice %30 {offsets = [0, 4], sizes = [16, 4], strides = [1, 1]} : vector<16x12xf32> to vector<16x4xf32>
    %33 = vector.extract_strided_slice %30 {offsets = [0, 8], sizes = [16, 4], strides = [1, 1]} : vector<16x12xf32> to vector<16x4xf32>
    %34 = vector.extract_strided_slice %32 {offsets = [0, 0], sizes = [15, 4], strides = [1, 1]} : vector<16x4xf32> to vector<15x4xf32>
    %35 = tpu.concatenate %27, %34 in 0 : vector<1x4xf32>, vector<15x4xf32> -> vector<16x4xf32>
    %cst_17 = arith.constant 0.000000e+00 : f32
    %36 = vector.broadcast %cst_17 : f32 to vector<16x4xf32>
    %37 = arith.select %24, %35, %36 : vector<16x4xi1>, vector<16x4xf32>
    %38 = vector.extract_strided_slice %33 {offsets = [1, 0], sizes = [15, 4], strides = [1, 1]} : vector<16x4xf32> to vector<15x4xf32>
    %39 = tpu.concatenate %38, %27 in 0 : vector<15x4xf32>, vector<1x4xf32> -> vector<16x4xf32>
    %cst_18 = arith.constant 0.000000e+00 : f32
    %40 = vector.broadcast %cst_18 : f32 to vector<16x4xf32>
    %41 = arith.select %26, %39, %40 : vector<16x4xi1>, vector<16x4xf32>
    %42 = arith.addf %31, %37 : vector<16x4xf32>
    %43 = arith.addf %42, %41 : vector<16x4xf32>
    %c0_19 = arith.constant 0 : index
    %c4 = arith.constant 4 : index
    %44 = vector.load %arg4[%c0_19, %c4] : memref<16x128xf32, #tpu.memory_space<vmem>>, vector<16x4xf32>
    tpu.vector_store %arg4[%c0_19, %c4], %43 {strides = array<i32>} : memref<16x128xf32, #tpu.memory_space<vmem>>, vector<16x4xf32>,
    %c0_20 = arith.constant 0 : index
    %c12 = arith.constant 12 : index
    %45 = vector.load %arg2[%c0_20, %c12] : memref<128x48xf32, #tpu.memory_space<vmem>>, vector<128x12xf32>
    %c0_21 = arith.constant 0 : index
    %c0_22 = arith.constant 0 : index
    %46 = vector.load %arg4[%c0_21, %c0_22] : memref<16x128xf32, #tpu.memory_space<vmem>>, vector<16x128xf32>
    %cst_23 = arith.constant dense<0.000000e+00> : vector<16x12xf32>
    %47 = tpu.matmul %46, %45, %cst_23 {dimension_numbers = #tpu.dot_dimension_numbers<[1], [0], [0], [1], [0, 0, 1, 1], [], []>} : vector<16x128xf32>, vector<128x12xf32>, vector<16x12xf32> -> vector<16x12xf32>
    %48 = vector.extract_strided_slice %47 {offsets = [0, 0], sizes = [16, 4], strides = [1, 1]} : vector<16x12xf32> to vector<16x4xf32>
    %49 = vector.extract_strided_slice %47 {offsets = [0, 4], sizes = [16, 4], strides = [1, 1]} : vector<16x12xf32> to vector<16x4xf32>
    %50 = vector.extract_strided_slice %47 {offsets = [0, 8], sizes = [16, 4], strides = [1, 1]} : vector<16x12xf32> to vector<16x4xf32>
    %51 = vector.extract_strided_slice %49 {offsets = [0, 0], sizes = [15, 4], strides = [1, 1]} : vector<16x4xf32> to vector<15x4xf32>
    %52 = tpu.concatenate %27, %51 in 0 : vector<1x4xf32>, vector<15x4xf32> -> vector<16x4xf32>
    %cst_24 = arith.constant 0.000000e+00 : f32
    %53 = vector.broadcast %cst_24 : f32 to vector<16x4xf32>
    %54 = arith.select %24, %52, %53 : vector<16x4xi1>, vector<16x4xf32>
    %55 = vector.extract_strided_slice %50 {offsets = [1, 0], sizes = [15, 4], strides = [1, 1]} : vector<16x4xf32> to vector<15x4xf32>
    %56 = tpu.concatenate %55, %27 in 0 : vector<15x4xf32>, vector<1x4xf32> -> vector<16x4xf32>
    %cst_25 = arith.constant 0.000000e+00 : f32
    %57 = vector.broadcast %cst_25 : f32 to vector<16x4xf32>
    %58 = arith.select %26, %56, %57 : vector<16x4xi1>, vector<16x4xf32>
    %59 = arith.addf %48, %54 : vector<16x4xf32>
    %60 = arith.addf %59, %58 : vector<16x4xf32>
    %c0_26 = arith.constant 0 : index
    %c8 = arith.constant 8 : index
    %61 = vector.load %arg4[%c0_26, %c8] : memref<16x128xf32, #tpu.memory_space<vmem>>, vector<16x4xf32>
    tpu.vector_store %arg4[%c0_26, %c8], %60 {strides = array<i32>} : memref<16x128xf32, #tpu.memory_space<vmem>>, vector<16x4xf32>,
    %c0_27 = arith.constant 0 : index
    %c24 = arith.constant 24 : index
    %62 = vector.load %arg2[%c0_27, %c24] : memref<128x48xf32, #tpu.memory_space<vmem>>, vector<128x12xf32>
    %c0_28 = arith.constant 0 : index
    %c0_29 = arith.constant 0 : index
    %63 = vector.load %arg4[%c0_28, %c0_29] : memref<16x128xf32, #tpu.memory_space<vmem>>, vector<16x128xf32>
    %cst_30 = arith.constant dense<0.000000e+00> : vector<16x12xf32>
    %64 = tpu.matmul %63, %62, %cst_30 {dimension_numbers = #tpu.dot_dimension_numbers<[1], [0], [0], [1], [0, 0, 1, 1], [], []>} : vector<16x128xf32>, vector<128x12xf32>, vector<16x12xf32> -> vector<16x12xf32>
    %65 = vector.extract_strided_slice %64 {offsets = [0, 0], sizes = [16, 4], strides = [1, 1]} : vector<16x12xf32> to vector<16x4xf32>
    %66 = vector.extract_strided_slice %64 {offsets = [0, 4], sizes = [16, 4], strides = [1, 1]} : vector<16x12xf32> to vector<16x4xf32>
    %67 = vector.extract_strided_slice %64 {offsets = [0, 8], sizes = [16, 4], strides = [1, 1]} : vector<16x12xf32> to vector<16x4xf32>
    %68 = vector.extract_strided_slice %66 {offsets = [0, 0], sizes = [15, 4], strides = [1, 1]} : vector<16x4xf32> to vector<15x4xf32>
    %69 = tpu.concatenate %27, %68 in 0 : vector<1x4xf32>, vector<15x4xf32> -> vector<16x4xf32>
    %cst_31 = arith.constant 0.000000e+00 : f32
    %70 = vector.broadcast %cst_31 : f32 to vector<16x4xf32>
    %71 = arith.select %24, %69, %70 : vector<16x4xi1>, vector<16x4xf32>
    %72 = vector.extract_strided_slice %67 {offsets = [1, 0], sizes = [15, 4], strides = [1, 1]} : vector<16x4xf32> to vector<15x4xf32>
    %73 = tpu.concatenate %72, %27 in 0 : vector<15x4xf32>, vector<1x4xf32> -> vector<16x4xf32>
    %cst_32 = arith.constant 0.000000e+00 : f32
    %74 = vector.broadcast %cst_32 : f32 to vector<16x4xf32>
    %75 = arith.select %26, %73, %74 : vector<16x4xi1>, vector<16x4xf32>
    %76 = arith.addf %65, %71 : vector<16x4xf32>
    %77 = arith.addf %76, %75 : vector<16x4xf32>
    %c0_33 = arith.constant 0 : index
    %c12_34 = arith.constant 12 : index
    %78 = vector.load %arg4[%c0_33, %c12_34] : memref<16x128xf32, #tpu.memory_space<vmem>>, vector<16x4xf32>
    tpu.vector_store %arg4[%c0_33, %c12_34], %77 {strides = array<i32>} : memref<16x128xf32, #tpu.memory_space<vmem>>, vector<16x4xf32>,
    %c0_35 = arith.constant 0 : index
    %c36 = arith.constant 36 : index
    %79 = vector.load %arg2[%c0_35, %c36] : memref<128x48xf32, #tpu.memory_space<vmem>>, vector<128x12xf32>
    %c0_36 = arith.constant 0 : index
    %c0_37 = arith.constant 0 : index
    %80 = vector.load %arg4[%c0_36, %c0_37] : memref<16x128xf32, #tpu.memory_space<vmem>>, vector<16x128xf32>
    %cst_38 = arith.constant dense<0.000000e+00> : vector<16x12xf32>
    %81 = tpu.matmul %80, %79, %cst_38 {dimension_numbers = #tpu.dot_dimension_numbers<[1], [0], [0], [1], [0, 0, 1, 1], [], []>} : vector<16x128xf32>, vector<128x12xf32>, vector<16x12xf32> -> vector<16x12xf32>
    %82 = vector.extract_strided_slice %81 {offsets = [0, 0], sizes = [16, 4], strides = [1, 1]} : vector<16x12xf32> to vector<16x4xf32>
    %83 = vector.extract_strided_slice %81 {offsets = [0, 4], sizes = [16, 4], strides = [1, 1]} : vector<16x12xf32> to vector<16x4xf32>
    %84 = vector.extract_strided_slice %81 {offsets = [0, 8], sizes = [16, 4], strides = [1, 1]} : vector<16x12xf32> to vector<16x4xf32>
    %85 = vector.extract_strided_slice %83 {offsets = [0, 0], sizes = [15, 4], strides = [1, 1]} : vector<16x4xf32> to vector<15x4xf32>
    %86 = tpu.concatenate %27, %85 in 0 : vector<1x4xf32>, vector<15x4xf32> -> vector<16x4xf32>
    %cst_39 = arith.constant 0.000000e+00 : f32
    %87 = vector.broadcast %cst_39 : f32 to vector<16x4xf32>
    %88 = arith.select %24, %86, %87 : vector<16x4xi1>, vector<16x4xf32>
    %89 = vector.extract_strided_slice %84 {offsets = [1, 0], sizes = [15, 4], strides = [1, 1]} : vector<16x4xf32> to vector<15x4xf32>
    %90 = tpu.concatenate %89, %27 in 0 : vector<15x4xf32>, vector<1x4xf32> -> vector<16x4xf32>
    %cst_40 = arith.constant 0.000000e+00 : f32
    %91 = vector.broadcast %cst_40 : f32 to vector<16x4xf32>
    %92 = arith.select %26, %90, %91 : vector<16x4xi1>, vector<16x4xf32>
    %93 = arith.addf %82, %88 : vector<16x4xf32>
    %94 = arith.addf %93, %92 : vector<16x4xf32>
    %c0_41 = arith.constant 0 : index
    %c16 = arith.constant 16 : index
    %95 = vector.load %arg4[%c0_41, %c16] : memref<16x128xf32, #tpu.memory_space<vmem>>, vector<16x4xf32>
    tpu.vector_store %arg4[%c0_41, %c16], %94 {strides = array<i32>} : memref<16x128xf32, #tpu.memory_space<vmem>>, vector<16x4xf32>,
    %c0_42 = arith.constant 0 : index
    %c0_43 = arith.constant 0 : index
    %96 = vector.load %arg4[%c0_42, %c0_43] : memref<16x128xf32, #tpu.memory_space<vmem>>, vector<16x128xf32>
    %cst_44 = arith.constant 0.000000e+00 : f32
    %97 = vector.broadcast %cst_44 : f32 to vector<16x128xf32>
    %98 = arith.maximumf %96, %97 : vector<16x128xf32>
    %c0_45 = arith.constant 0 : index
    %c0_46 = arith.constant 0 : index
    %99 = vector.load %arg3[%c0_45, %c0_46] : memref<16x128xf32, #tpu.memory_space<vmem>>, vector<16x128xf32>
    tpu.vector_store %arg3[%c0_45, %c0_46], %98 {strides = array<i32>} : memref<16x128xf32, #tpu.memory_space<vmem>>, vector<16x128xf32>,
    return
  }
  func.func @transform_0(%arg0: i32) -> (i32, i32) {
    %c0_i32 = arith.constant 0 : i32
    %c0_i32_0 = arith.constant 0 : i32
    return %arg0, %c0_i32 : i32, i32
  }
  func.func @transform_1(%arg0: i32) -> (i32, i32) {
    %c0_i32 = arith.constant 0 : i32
    %c0_i32_0 = arith.constant 0 : i32
    %c0_i32_1 = arith.constant 0 : i32
    return %c0_i32, %c0_i32_0 : i32, i32
  }
  func.func @transform_2(%arg0: i32) -> (i32, i32) {
    %c0_i32 = arith.constant 0 : i32
    %c0_i32_0 = arith.constant 0 : i32
    return %arg0, %c0_i32 : i32, i32
  }
}

</mosaic_0001>

<bundles_post_ra>
// kernel: tpu_custom_call.1
= control target key start
LH: loop header
LB: loop body
LE: loop exit
PB: predicated region body
PF: predicated region fallthrough
CT: control target
= control target key end

     0   :  { %7 = vsyncpa [#allocation4], 0  ;;  %s1748_s0 = inlined_call_operand.vmem [shape: f32[32,4], index: 0, kind: input, shape index: {}]   ;;  %s1749_s1 = inlined_call_operand.vmem [shape: f32[128,48], index: 1, kind: input, shape index: {}]   ;;  %s1750_s2 = inlined_call_operand.hbm [shape: f32[32,128], index: 2, kind: output, shape index: {}]  }
   0x1   :  { %9 = vsyncpa [#allocation4 + $0x1], 0  ;;  %s1380_s9 = smov 0   ;;  %s1382_s10 = smov 0  }
   0x2   :  { %s1384_s11 = smov 0   ;;  %s1386_s12 = smov 0  }
   0x3 LB: > { %s1401_s13 = sadd.s32 4294967295, %s1350_s12   ;;  %s1014_s14 = sadd.s32 4294967294, %s1350_s12   ;;  %s1350_s12 = sphi %s1386_s12, %s1760_s12   ;;  %s1346_s11 = sphi %s1384_s11, %s1759_s11   ;;  %s1342_s10 = sphi %s1382_s10, %s1758_s10   ;;  %s1338_s9 = sphi %s1380_s9, %s1757_s9  }
   0x4   : > { %s1405_s15 = sadd.s32 1, %s1350_s12   ;;  %s69_s16 = sadd.s32 1, %s1346_s11 }
   0x5   : > { %s66_s17 = ssub.s32 %s1350_s12, %s1405_s15  ;;  %p79_p0 = scmp.ne.s32.totalorder %s1346_s11, %s1342_s10 }
   0x6   : > { %p67_p1 = scmp.eq.s32.totalorder %s66_s17, 0  ;;  %p80_p2 = scmp.eq.s32.totalorder %s1401_s13, 1 }
   0x7   : > { %p85_p3 = scmp.ne.s32.totalorder %s1342_s10, %s1338_s9  ;;  %p86_p4 = scmp.eq.s32.totalorder %s1014_s14, 1 }
   0x8   : > { %s1416_s18 = scalar_select %p67_p1, %s1346_s11, %s69_s16  }
   0x9   : > { %p1418_p5 = por %p80_p2, %p79_p0  ;;  %p1422_p6 = por %p86_p4, %p85_p3 }
   0xa   : > { %p1017_p7 = scmp.ge.s32.totalorder %s1350_s12, 1  ;;  %p116_p8 = scmp.lt.s32.totalorder %s1350_s12, 3 }
   0xc   : > { %p117_p9 = pnand %p1017_p7, %p116_p8 }
   0xd   : > { %s1019_s25 = sshll.u32 (!%p117_p9), %s1401_s13, 1  ;;  %s1354_s17 = smov (!%p117_p9), 124  }
   0xe   : > { %120 = sbr.rel (%p117_p9) target bundleno = 1845 (0x735), region = 28  ;;  %p139_p10 = scmp.lt.s32.totalorder (!%p117_p9), %s1019_s25, 3 }
   0xf   : > { %s1355_s21 = smov (!%p117_p9), 120   ;;  %s1356_s22 = smov (!%p117_p9), 116  }
  0x10   : > { %s1357_s23 = smov (!%p117_p9), 4   ;;  %s1358_s24 = smov (!%p117_p9), 104  }
  0x11   : > { %s1360_s26 = smov (!%p117_p9), 92   ;;  %s1361_s27 = smov (!%p117_p9), 12  }
  0x12   : > { %s1362_s28 = smov (!%p117_p9), 16   ;;  %s135_s29 = sand.u32 (!%p117_p9), 1, %s1342_s10  }
  0x13   : > { %v1431_v0 = vld [vmem:[%s1749_s1 + $0x78] sm:$0xff]  ;;  %v1436_v1 = vld [vmem:[%s1749_s1 + $0x70] sm:$0xff]  ;;  %v1352_v2 = vmov 0.0   ;;  %v1444_v3 = vld [vmem:[%s1749_s1 + $0x68] sm:$0xff]  ;;  %s1762_s25 = smov (!%p139_p10, %s1019_s25), 3  ;;  %vm149_vm0 = vcmask 31744   ;;  %v155_v22 = vlaneseq }
  0x14   : > { %1099 = vmatprep.subr.mxu0 %v1431_v0  ;;  %145 = vst [vmem:[#allocation2] sm:$0xff] %v1352_v2  ;;  %146 = vst [vmem:[#allocation2 + $0x8] sm:$0xff] %v1352_v2  ;;  %v1451_v4 = vld [vmem:[%s1749_s1 + $0x60] sm:$0xff]  ;;  %s1020_s30 = sshll.u32 %s1762_s25, 3  ;;  %v1458_v5 = vld [vmem:[%s1749_s1 + $0x58] sm:$0xff]  ;;  %vm152_vm1 = vcmask 1048568  }
  0x15   : > { %1100 = vmatpush3.msra.mxu0 %v1431_v0  ;;  %s142_s7 = scalar_lea.vmem %s1748_s0, %s1020_s30  ;;  %v1468_v8 = vld [vmem:[%s1749_s1 + $0x50] sm:$0xff]  ;;  %v1353_v9 = vmov 1.0   ;;  %v1475_v10 = vld [vmem:[%s1749_s1 + $0x48] sm:$0xff]  ;;  %v1482_v11 = vld [vmem:[%s1749_s1 + $0x40] sm:$0xff]  ;;  %v156_v23 = vshrl.u32 %v155_v22, 7  ;;  %vm294_vm2 = vcmask 1046528  }
  0x16   : > { %1101 = vmatprep.subr.mxu0 %v1436_v1  ;;  %v147_v6 = vld [vmem:[%s142_s7] sm:$0xff]  ;;  %v148_v7 = vld [vmem:[%s142_s7 + $0x8] sm:$0xff]  ;;  %v1489_v12 = vld [vmem:[%s1749_s1 + $0x38] sm:$0xff]  ;;  %vm281_vm3 = vcmask 1040384   ;;  %vm323_vm6 = vcmask 64544   ;;  %s1359_s25 = smov 8  }
  0x17   : > { %1102 = vmatpush3.msra.mxu0 %v1436_v1  ;;  %150 = vst.msk [vmem:[#allocation2] sm:$0xff] %vm149_vm0, %v147_v6  ;;  %151 = vst.msk [vmem:[#allocation2 + $0x8] sm:$0xff] %vm149_vm0, %v148_v7  ;;  %v1496_v13 = vld [vmem:[%s1749_s1 + $0x30] sm:$0xff]  ;;  %v1503_v15 = vld [vmem:[%s1749_s1 + $0x28] sm:$0xff]  ;;  %v157_v24 = vadd.s32 8, %v156_v23  ;;  %v162_v37 = vand.u32 15, %v156_v23 }
  0x18   : > { %1103 = vmatprep.subr.mxu0 %v1444_v3  ;;  %153 = vst.msk [vmem:[#allocation2] sm:$0xff] %vm152_vm1, %v1353_v9  ;;  %154 = vst.msk [vmem:[#allocation2 + $0x8] sm:$0xff] %vm152_vm1, %v1353_v9  ;;  %v1510_v16 = vld [vmem:[%s1749_s1 + $0x20] sm:$0xff]  ;;  %v1517_v17 = vld [vmem:[%s1749_s1 + $0x18] sm:$0xff]  ;;  %vm525_vm7 = vcmask 97344   ;;  %vm727_vm8 = vcmask 130144  }
  0x19   : > { %1104 = vmatpush3.msra.mxu0 %v1444_v3  ;;  %v1524_v18 = vld [vmem:[%s1749_s1 + $0x10] sm:$0xff]  ;;  %v1531_v19 = vld [vmem:[%s1749_s1 + $0x8] sm:$0xff]  ;;  %v1538_v20 = vld [vmem:[%s1749_s1] sm:$0xff]  ;;  %v169_v28 = vand.u32 15, %v157_v24  ;;  %vm1581_vm5 = vcmp.ne.s32.totalorder %v162_v37, 0  ;;  %vm929_vm9 = vcmask 162944  }
  0x1a   : > { %1105 = vmatprep.subr.mxu0 %v1451_v4  ;;  %s1018_s30 = sshll.u32 %s135_s29, 4  ;;  %s1026_s3 = sshll.u32 %s1401_s13, 8 }
  0x1b   : > { %1106 = vmatpush3.msra.mxu0 %v1451_v4  ;;  %vm1547_vm4 = vcmp.ne.s32.totalorder %v169_v28, 15  ;;  %s137_s4 = scalar_lea.vmem [#allocation3], %s1018_s30  ;;  %s1703_s8 = scalar_lea.hbm %s1750_s2, %s1026_s3 }
  0x1c   : > { %1107 = vmatprep.subr.mxu0 %v1458_v5  ;;  %s952_s5 = sshll.u32 %s137_s4, 4  ;;  %s1707_s14 = scalar_lea.sflag [#allocation4], %s135_s29  ;;  %s1705_s5 = int_to_ptr.vmem [resolvable:$true] %s952_s5 }
  0x1d   : > { %1108 = vmatpush3.msra.mxu0 %v1458_v5  ;;  %s1290_s13 = scalar_lea.vmem %s1705_s5, 256  ;;  %s1363_s16 = smov [#allocation3]  }
  0x1e   : > { %1109 = vmatprep.subr.mxu0 %v1468_v8  ;;  %p1291_p11 = scmp.ne.s32.totalorder %s1705_s5, %s1290_s13 }
  0x1f   : > { %1110 = vmatpush3.msra.mxu0 %v1468_v8  ;;  %v202_v14 = vld [vmem:[#allocation2] sm:$0xff]  ;;  %v203_v21 = vld [vmem:[#allocation2 + $0x8] sm:$0xff] }
  0x20   : > { %1111 = vmatprep.subr.mxu0 %v1475_v10  ;;  %1131 = vmatprep.mubr.f32.mxu0 %v202_v14  ;;  %p1292_p12 = pnand %p1291_p11, %p1418_p5 }
  0x21   : > { %1112 = vmatpush3.msra.mxu0 %v1475_v10 }
  0x22   : > { %1113 = vmatprep.subr.mxu0 %v1482_v11  ;;  %p1293_p13 = pneg %p1292_p12 }
  0x23   : > { %1114 = vmatpush3.msra.mxu0 %v1482_v11 }
  0x24   : > { %1115 = vmatprep.subr.mxu0 %v1489_v12 }
  0x25   : > { %1116 = vmatpush3.msra.mxu0 %v1489_v12 }
  0x26   : > { %1117 = vmatprep.subr.mxu0 %v1496_v13 }
  0x27   : > { %1118 = vmatpush3.msra.mxu0 %v1496_v13 }
  0x28   : > { %1119 = vmatprep.subr.mxu0 %v1503_v15 }
  0x29   : > { %1120 = vmatpush3.msra.mxu0 %v1503_v15 }
  0x2a   : > { %1121 = vmatprep.subr.mxu0 %v1510_v16 }
  0x2b   : > { %1122 = vmatpush3.msra.mxu0 %v1510_v16 }
  0x2c   : > { %1123 = vmatprep.subr.mxu0 %v1517_v17 }
  0x2d   : > { %1124 = vmatpush3.msra.mxu0 %v1517_v17 }
  0x2e   : > { %1125 = vmatprep.subr.mxu0 %v1524_v18 }
  0x2f   : > { %1126 = vmatpush3.msra.mxu0 %v1524_v18 }
  0x30   : > { %1127 = vmatprep.subr.mxu0 %v1531_v19 }
  0x31   : > { %1128 = vmatpush3.msra.mxu0 %v1531_v19 }
  0x32   : > { %1129 = vmatprep.subr.mxu0 %v1538_v20 }
  0x33   : > { %1130 = vmatpush3.msra.mxu0 %v1538_v20 }
  0x34   : > { %1132 = vmatmul.mubr.f32.vlgmr.msra.gmra.mxu0 %v203_v21 }
  0xf4   : > { %v1133_v25 = vpop.f32.mrf.mxu0 }
  0xf5   : > { %v296_v26 = vrot.slane %v1133_v25, 1  ;;  %v283_v32 = vrot.slane %v1133_v25, 7 }
  0xf6   : > { %v270_v27 = vpop.f32.mrf.mxu0 }
  0xf7   : > { %v295_v29 = vrot.slane %v270_v27, 1  ;;  %v282_v30 = vrot.slane %v270_v27, 7  ;;  %v300_v34 = vsel %vm294_vm2, %v296_v26, 0.0 }
  0xf8   : > { %v302_v36 = vsel %vm1547_vm4, %v300_v34, 0.0 }
  0xf9   : > { %285 = vrot.lane.b32.xlu0 %v282_v30, %s1354_s17  ;;  %v297_v31 = vsel %vm294_vm2, %v295_v29, %v296_v26  ;;  %v284_v35 = vsel %vm281_vm3, %v282_v30, %v283_v32 }
  0xfa   : > { %307 = vrot.lane.b32.xlu1 %v297_v31, %s1355_s21 }
  0xfd   : > { %287 = vrot.lane.b32.xlu0 %v284_v35, %s1354_s17 }
  0xfe   : > { %309 = vrot.lane.b32.xlu1 %v302_v36, %s1355_s21 }
 0x101   : > { %390 = vrot.lane.b32.xlu0 %v1431_v0, %s1356_s22 }
 0x102   : > { %388 = vrot.lane.b32.xlu1 %v1436_v1, %s1356_s22 }
 0x105   : > { %386 = vrot.lane.b32.xlu0 %v1444_v3, %s1356_s22 }
 0x106   : > { %384 = vrot.lane.b32.xlu1 %v1451_v4, %s1356_s22 }
 0x109   : > { %382 = vrot.lane.b32.xlu0 %v1458_v5, %s1356_s22 }
 0x10a   : > { %380 = vrot.lane.b32.xlu1 %v1468_v8, %s1356_s22 }
 0x10d   : > { %378 = vrot.lane.b32.xlu0 %v1475_v10, %s1356_s22 }
 0x10e   : > { %376 = vrot.lane.b32.xlu1 %v1482_v11, %s1356_s22 }
 0x111   : > { %374 = vrot.lane.b32.xlu0 %v1489_v12, %s1356_s22 }
 0x112   : > { %372 = vrot.lane.b32.xlu1 %v1496_v13, %s1356_s22 }
 0x115   : > { %370 = vrot.lane.b32.xlu0 %v1503_v15, %s1356_s22 }
 0x116   : > { %368 = vrot.lane.b32.xlu1 %v1510_v16, %s1356_s22 }
 0x16b   : > { %v286_v39 = vpop.permute.xlu0 %285 }
 0x16c   : > { %v291_v40 = vsel %vm281_vm3, 0.0, %v286_v39  ;;  %v308_v41 = vpop.permute.xlu1 %307 }
 0x16d   : > { %v292_v42 = vsel %vm1581_vm5, %v291_v40, 0.0 }
 0x16e   : > { %v303_v43 = vadd.f32 %v292_v42, %v270_v27 }
 0x16f   : > { %v288_v44 = vpop.permute.xlu0 %287 }
 0x170   : > { %v313_v45 = vadd.f32 %v308_v41, %v303_v43  ;;  %v304_v46 = vadd.f32 %v1133_v25, %v288_v44  ;;  %v310_v47 = vpop.permute.xlu1 %309 }
 0x172   : > { %v314_v48 = vadd.f32 %v310_v47, %v304_v46  ;;  %317 = vrot.lane.b32.xlu0 %v313_v45, %s1357_s23 }
 0x173   : > { %v391_v49 = vpop.permute.xlu0 %390 }
 0x174   : > { %319 = vrot.lane.b32.xlu1 %v314_v48, %s1357_s23  ;;  %1134 = vmatprep.subr.mxu1 %v391_v49  ;;  %v389_v50 = vpop.permute.xlu1 %388 }
 0x175   : > { %1135 = vmatpush3.msra.mxu1 %v391_v49 }
 0x176   : > { %366 = vrot.lane.b32.xlu0 %v1517_v17, %s1356_s22  ;;  %1136 = vmatprep.subr.mxu1 %v389_v50 }
 0x177   : > { %1137 = vmatpush3.msra.mxu1 %v389_v50  ;;  %v387_v51 = vpop.permute.xlu0 %386 }
 0x178   : > { %364 = vrot.lane.b32.xlu1 %v1524_v18, %s1356_s22  ;;  %1138 = vmatprep.subr.mxu1 %v387_v51  ;;  %v385_v52 = vpop.permute.xlu1 %384 }
 0x179   : > { %1139 = vmatpush3.msra.mxu1 %v387_v51 }
 0x17a   : > { %362 = vrot.lane.b32.xlu0 %v1531_v19, %s1356_s22  ;;  %1140 = vmatprep.subr.mxu1 %v385_v52 }
 0x17b   : > { %1141 = vmatpush3.msra.mxu1 %v385_v52  ;;  %v383_v53 = vpop.permute.xlu0 %382 }
 0x17c   : > { %360 = vrot.lane.b32.xlu1 %v1538_v20, %s1356_s22  ;;  %1142 = vmatprep.subr.mxu1 %v383_v53  ;;  %v381_v54 = vpop.permute.xlu1 %380 }
 0x17d   : > { %1143 = vmatpush3.msra.mxu1 %v383_v53 }
 0x17e   : > { %1144 = vmatprep.subr.mxu1 %v381_v54 }
 0x17f   : > { %1145 = vmatpush3.msra.mxu1 %v381_v54  ;;  %v379_v55 = vpop.permute.xlu0 %378 }
 0x180   : > { %1146 = vmatprep.subr.mxu1 %v379_v55  ;;  %v377_v56 = vpop.permute.xlu1 %376 }
 0x181   : > { %1147 = vmatpush3.msra.mxu1 %v379_v55 }
 0x182   : > { %1148 = vmatprep.subr.mxu1 %v377_v56 }
 0x183   : > { %1149 = vmatpush3.msra.mxu1 %v377_v56  ;;  %v375_v57 = vpop.permute.xlu0 %374 }
 0x184   : > { %1150 = vmatprep.subr.mxu1 %v375_v57  ;;  %v373_v58 = vpop.permute.xlu1 %372 }
 0x185   : > { %1151 = vmatpush3.msra.mxu1 %v375_v57 }
 0x186   : > { %1152 = vmatprep.subr.mxu1 %v373_v58 }
 0x187   : > { %1153 = vmatpush3.msra.mxu1 %v373_v58  ;;  %v371_v59 = vpop.permute.xlu0 %370 }
 0x188   : > { %1154 = vmatprep.subr.mxu1 %v371_v59  ;;  %v369_v60 = vpop.permute.xlu1 %368 }
 0x189   : > { %1155 = vmatpush3.msra.mxu1 %v371_v59 }
 0x18a   : > { %1156 = vmatprep.subr.mxu1 %v369_v60 }
 0x18b   : > { %1157 = vmatpush3.msra.mxu1 %v369_v60 }
 0x1e4   : > { %v318_v61 = vpop.permute.xlu0 %317 }
 0x1e5   : > { %324 = vst.msk [vmem:[#allocation2] sm:$0xff] %vm323_vm6, %v318_v61 }
 0x1e6   : > { %v320_v62 = vpop.permute.xlu1 %319 }
 0x1e7   : > { %325 = vst.msk [vmem:[#allocation2 + $0x8] sm:$0xff] %vm323_vm6, %v320_v62 }
 0x1e8   : > { %v367_v63 = vpop.permute.xlu0 %366 }
 0x1e9   : > { %1158 = vmatprep.subr.mxu1 %v367_v63 }
 0x1ea   : > { %v365_v2 = vpop.permute.xlu1 %364  ;;  %1159 = vmatpush3.msra.mxu1 %v367_v63 }
 0x1eb   : > { %1160 = vmatprep.subr.mxu1 %v365_v2 }
 0x1ec   : > { %1161 = vmatpush3.msra.mxu1 %v365_v2  ;;  %v363_v6 = vpop.permute.xlu0 %362  ;;  %v342_v7 = vld [vmem:[#allocation2] sm:$0xff] }
 0x1ed   : > { %1162 = vmatprep.subr.mxu1 %v363_v6  ;;  %1166 = vmatprep.mubr.f32.mxu1 %v342_v7 }
 0x1ee   : > { %v361_v9 = vpop.permute.xlu1 %360  ;;  %1163 = vmatpush3.msra.mxu1 %v363_v6  ;;  %v343_v14 = vld [vmem:[#allocation2 + $0x8] sm:$0xff] }
 0x1ef   : > { %1164 = vmatprep.subr.mxu1 %v361_v9 }
 0x1f0   : > { %1165 = vmatpush3.msra.mxu1 %v361_v9 }
 0x1f1   : > { %1167 = vmatmul.mubr.f32.vlgmr.msra.gmra.mxu1 %v343_v14 }
 0x2b1   : > { %v1168_v21 = vpop.f32.mrf.mxu1 }
 0x2b2   : > { %v498_v22 = vrot.slane %v1168_v21, 1  ;;  %v486_v24 = vrot.slane %v1168_v21, 7 }
 0x2b3   : > { %v474_v23 = vpop.f32.mrf.mxu1 }
 0x2b4   : > { %v485_v25 = vrot.slane %v474_v23, 7  ;;  %v497_v26 = vrot.slane %v474_v23, 1  ;;  %v502_v28 = vsel %vm294_vm2, %v498_v22, 0.0 }
 0x2b5   : > { %v504_v30 = vsel %vm1547_vm4, %v502_v28, 0.0 }
 0x2b6   : > { %488 = vrot.lane.b32.xlu0 %v485_v25, %s1354_s17  ;;  %v487_v27 = vsel %vm281_vm3, %v485_v25, %v486_v24  ;;  %v499_v29 = vsel %vm294_vm2, %v497_v26, %v498_v22 }
 0x2b7   : > { %490 = vrot.lane.b32.xlu1 %v487_v27, %s1354_s17 }
 0x2ba   : > { %509 = vrot.lane.b32.xlu0 %v499_v29, %s1355_s21 }
 0x2bb   : > { %511 = vrot.lane.b32.xlu1 %v504_v30, %s1355_s21 }
 0x2be   : > { %592 = vrot.lane.b32.xlu0 %v1431_v0, %s1358_s24 }
 0x2bf   : > { %590 = vrot.lane.b32.xlu1 %v1436_v1, %s1358_s24 }
 0x2c2   : > { %588 = vrot.lane.b32.xlu0 %v1444_v3, %s1358_s24 }
 0x2c3   : > { %586 = vrot.lane.b32.xlu1 %v1451_v4, %s1358_s24 }
 0x2c6   : > { %584 = vrot.lane.b32.xlu0 %v1458_v5, %s1358_s24 }
 0x2c7   : > { %582 = vrot.lane.b32.xlu1 %v1468_v8, %s1358_s24 }
 0x2ca   : > { %580 = vrot.lane.b32.xlu0 %v1475_v10, %s1358_s24 }
 0x2cb   : > { %578 = vrot.lane.b32.xlu1 %v1482_v11, %s1358_s24 }
 0x2ce   : > { %576 = vrot.lane.b32.xlu0 %v1489_v12, %s1358_s24 }
 0x2cf   : > { %574 = vrot.lane.b32.xlu1 %v1496_v13, %s1358_s24 }
 0x2d2   : > { %572 = vrot.lane.b32.xlu0 %v1503_v15, %s1358_s24 }
 0x2d3   : > { %570 = vrot.lane.b32.xlu1 %v1510_v16, %s1358_s24 }
 0x328   : > { %v489_v31 = vpop.permute.xlu0 %488 }
 0x329   : > { %v494_v32 = vsel %vm281_vm3, 0.0, %v489_v31  ;;  %v491_v34 = vpop.permute.xlu1 %490 }
 0x32a   : > { %v495_v35 = vsel %vm1581_vm5, %v494_v32, 0.0  ;;  %v506_v37 = vadd.f32 %v1168_v21, %v491_v34 }
 0x32b   : > { %v505_v36 = vadd.f32 %v495_v35, %v474_v23 }
 0x32c   : > { %v510_v39 = vpop.permute.xlu0 %509 }
 0x32d   : > { %v515_v40 = vadd.f32 %v510_v39, %v505_v36  ;;  %v512_v41 = vpop.permute.xlu1 %511 }
 0x32e   : > { %v516_v42 = vadd.f32 %v512_v41, %v506_v37 }
 0x32f   : > { %519 = vrot.lane.b32.xlu0 %v515_v40, %s1359_s25 }
 0x330   : > { %521 = vrot.lane.b32.xlu1 %v516_v42, %s1359_s25  ;;  %v593_v43 = vpop.permute.xlu0 %592 }
 0x331   : > { %1169 = vmatprep.subr.mxu0 %v593_v43  ;;  %v591_v44 = vpop.permute.xlu1 %590 }
 0x332   : > { %1170 = vmatpush3.msra.mxu0 %v593_v43 }
 0x333   : > { %568 = vrot.lane.b32.xlu0 %v1517_v17, %s1358_s24  ;;  %1171 = vmatprep.subr.mxu0 %v591_v44 }
 0x334   : > { %566 = vrot.lane.b32.xlu1 %v1524_v18, %s1358_s24  ;;  %v589_v45 = vpop.permute.xlu0 %588  ;;  %1172 = vmatpush3.msra.mxu0 %v591_v44 }
 0x335   : > { %1173 = vmatprep.subr.mxu0 %v589_v45  ;;  %v587_v46 = vpop.permute.xlu1 %586 }
 0x336   : > { %1174 = vmatpush3.msra.mxu0 %v589_v45 }
 0x337   : > { %564 = vrot.lane.b32.xlu0 %v1531_v19, %s1358_s24  ;;  %1175 = vmatprep.subr.mxu0 %v587_v46 }
 0x338   : > { %562 = vrot.lane.b32.xlu1 %v1538_v20, %s1358_s24  ;;  %v585_v47 = vpop.permute.xlu0 %584  ;;  %1176 = vmatpush3.msra.mxu0 %v587_v46 }
 0x339   : > { %1177 = vmatprep.subr.mxu0 %v585_v47  ;;  %v583_v48 = vpop.permute.xlu1 %582 }
 0x33a   : > { %1178 = vmatpush3.msra.mxu0 %v585_v47 }
 0x33b   : > { %1179 = vmatprep.subr.mxu0 %v583_v48 }
 0x33c   : > { %v581_v49 = vpop.permute.xlu0 %580  ;;  %1180 = vmatpush3.msra.mxu0 %v583_v48 }
 0x33d   : > { %1181 = vmatprep.subr.mxu0 %v581_v49  ;;  %v579_v50 = vpop.permute.xlu1 %578 }
 0x33e   : > { %1182 = vmatpush3.msra.mxu0 %v581_v49 }
 0x33f   : > { %1183 = vmatprep.subr.mxu0 %v579_v50 }
 0x340   : > { %v577_v51 = vpop.permute.xlu0 %576  ;;  %1184 = vmatpush3.msra.mxu0 %v579_v50 }
 0x341   : > { %1185 = vmatprep.subr.mxu0 %v577_v51  ;;  %v575_v52 = vpop.permute.xlu1 %574 }
 0x342   : > { %1186 = vmatpush3.msra.mxu0 %v577_v51 }
 0x343   : > { %1187 = vmatprep.subr.mxu0 %v575_v52 }
 0x344   : > { %v573_v53 = vpop.permute.xlu0 %572  ;;  %1188 = vmatpush3.msra.mxu0 %v575_v52 }
 0x345   : > { %1189 = vmatprep.subr.mxu0 %v573_v53  ;;  %v571_v54 = vpop.permute.xlu1 %570 }
 0x346   : > { %1190 = vmatpush3.msra.mxu0 %v573_v53 }
 0x347   : > { %1191 = vmatprep.subr.mxu0 %v571_v54 }
 0x348   : > { %1192 = vmatpush3.msra.mxu0 %v571_v54 }
 0x3a1   : > { %v520_v55 = vpop.permute.xlu0 %519 }
 0x3a2   : > { %526 = vst.msk [vmem:[#allocation2] sm:$0xff] %vm525_vm7, %v520_v55  ;;  %v522_v56 = vpop.permute.xlu1 %521 }
 0x3a3   : > { %527 = vst.msk [vmem:[#allocation2 + $0x8] sm:$0xff] %vm525_vm7, %v522_v56 }
 0x3a5   : > { %v569_v57 = vpop.permute.xlu0 %568 }
 0x3a6   : > { %1193 = vmatprep.subr.mxu0 %v569_v57  ;;  %v567_v58 = vpop.permute.xlu1 %566 }
 0x3a7   : > { %1194 = vmatpush3.msra.mxu0 %v569_v57 }
 0x3a8   : > { %1195 = vmatprep.subr.mxu0 %v567_v58 }
 0x3a9   : > { %v565_v59 = vpop.permute.xlu0 %564  ;;  %1196 = vmatpush3.msra.mxu0 %v567_v58  ;;  %v544_v60 = vld [vmem:[#allocation2] sm:$0xff] }
 0x3aa   : > { %1197 = vmatprep.subr.mxu0 %v565_v59  ;;  %1201 = vmatprep.mubr.f32.mxu0 %v544_v60  ;;  %v563_v61 = vpop.permute.xlu1 %562  ;;  %v545_v62 = vld [vmem:[#allocation2 + $0x8] sm:$0xff] }
 0x3ab   : > { %1198 = vmatpush3.msra.mxu0 %v565_v59 }
 0x3ac   : > { %1199 = vmatprep.subr.mxu0 %v563_v61 }
 0x3ad   : > { %1200 = vmatpush3.msra.mxu0 %v563_v61 }
 0x3ae   : > { %1202 = vmatmul.mubr.f32.vlgmr.msra.gmra.mxu0 %v545_v62 }
 0x46e   : > { %v1203_v63 = vpop.f32.mrf.mxu0 }
 0x46f   : > { %v700_v2 = vrot.slane %v1203_v63, 1  ;;  %v688_v7 = vrot.slane %v1203_v63, 7 }
 0x470   : > { %v676_v6 = vpop.f32.mrf.mxu0 }
 0x471   : > { %v687_v9 = vrot.slane %v676_v6, 7  ;;  %v699_v14 = vrot.slane %v676_v6, 1  ;;  %v704_v22 = vsel %vm294_vm2, %v700_v2, 0.0 }
 0x472   : > { %v706_v24 = vsel %vm1547_vm4, %v704_v22, 0.0 }
 0x473   : > { %690 = vrot.lane.b32.xlu0 %v687_v9, %s1354_s17  ;;  %v689_v21 = vsel %vm281_vm3, %v687_v9, %v688_v7  ;;  %v701_v23 = vsel %vm294_vm2, %v699_v14, %v700_v2 }
 0x474   : > { %692 = vrot.lane.b32.xlu1 %v689_v21, %s1354_s17 }
 0x477   : > { %711 = vrot.lane.b32.xlu0 %v701_v23, %s1355_s21 }
 0x478   : > { %713 = vrot.lane.b32.xlu1 %v706_v24, %s1355_s21 }
 0x47b   : > { %794 = vrot.lane.b32.xlu0 %v1431_v0, %s1360_s26 }
 0x47c   : > { %792 = vrot.lane.b32.xlu1 %v1436_v1, %s1360_s26 }
 0x47f   : > { %790 = vrot.lane.b32.xlu0 %v1444_v3, %s1360_s26 }
 0x480   : > { %788 = vrot.lane.b32.xlu1 %v1451_v4, %s1360_s26 }
 0x483   : > { %786 = vrot.lane.b32.xlu0 %v1458_v5, %s1360_s26 }
 0x484   : > { %784 = vrot.lane.b32.xlu1 %v1468_v8, %s1360_s26 }
 0x487   : > { %782 = vrot.lane.b32.xlu0 %v1475_v10, %s1360_s26 }
 0x488   : > { %780 = vrot.lane.b32.xlu1 %v1482_v11, %s1360_s26 }
 0x48b   : > { %778 = vrot.lane.b32.xlu0 %v1489_v12, %s1360_s26 }
 0x48c   : > { %776 = vrot.lane.b32.xlu1 %v1496_v13, %s1360_s26 }
 0x48f   : > { %774 = vrot.lane.b32.xlu0 %v1503_v15, %s1360_s26 }
 0x490   : > { %772 = vrot.lane.b32.xlu1 %v1510_v16, %s1360_s26 }
 0x4e5   : > { %v691_v0 = vpop.permute.xlu0 %690 }
 0x4e6   : > { %v696_v1 = vsel %vm281_vm3, 0.0, %v691_v0  ;;  %v693_v3 = vpop.permute.xlu1 %692 }
 0x4e7   : > { %v697_v4 = vsel %vm1581_vm5, %v696_v1, 0.0  ;;  %v708_v8 = vadd.f32 %v1203_v63, %v693_v3 }
 0x4e8   : > { %v707_v5 = vadd.f32 %v697_v4, %v676_v6 }
 0x4e9   : > { %v712_v10 = vpop.permute.xlu0 %711 }
 0x4ea   : > { %v717_v11 = vadd.f32 %v712_v10, %v707_v5  ;;  %v714_v12 = vpop.permute.xlu1 %713 }
 0x4eb   : > { %v718_v25 = vadd.f32 %v714_v12, %v708_v8 }
 0x4ec   : > { %721 = vrot.lane.b32.xlu0 %v717_v11, %s1361_s27 }
 0x4ed   : > { %723 = vrot.lane.b32.xlu1 %v718_v25, %s1361_s27  ;;  %v795_v13 = vpop.permute.xlu0 %794 }
 0x4ee   : > { %1204 = vmatprep.subr.mxu1 %v795_v13  ;;  %v793_v15 = vpop.permute.xlu1 %792 }
 0x4ef   : > { %1205 = vmatpush3.msra.mxu1 %v795_v13 }
 0x4f0   : > { %770 = vrot.lane.b32.xlu0 %v1517_v17, %s1360_s26  ;;  %1206 = vmatprep.subr.mxu1 %v793_v15 }
 0x4f1   : > { %768 = vrot.lane.b32.xlu1 %v1524_v18, %s1360_s26  ;;  %v791_v16 = vpop.permute.xlu0 %790  ;;  %1207 = vmatpush3.msra.mxu1 %v793_v15 }
 0x4f2   : > { %1208 = vmatprep.subr.mxu1 %v791_v16  ;;  %v789_v26 = vpop.permute.xlu1 %788 }
 0x4f3   : > { %1209 = vmatpush3.msra.mxu1 %v791_v16 }
 0x4f4   : > { %766 = vrot.lane.b32.xlu0 %v1531_v19, %s1360_s26  ;;  %1210 = vmatprep.subr.mxu1 %v789_v26 }
 0x4f5   : > { %764 = vrot.lane.b32.xlu1 %v1538_v20, %s1360_s26  ;;  %v787_v27 = vpop.permute.xlu0 %786  ;;  %1211 = vmatpush3.msra.mxu1 %v789_v26 }
 0x4f6   : > { %1212 = vmatprep.subr.mxu1 %v787_v27  ;;  %v785_v17 = vpop.permute.xlu1 %784 }
 0x4f7   : > { %1213 = vmatpush3.msra.mxu1 %v787_v27 }
 0x4f8   : > { %1214 = vmatprep.subr.mxu1 %v785_v17 }
 0x4f9   : > { %v783_v28 = vpop.permute.xlu0 %782  ;;  %1215 = vmatpush3.msra.mxu1 %v785_v17 }
 0x4fa   : > { %1216 = vmatprep.subr.mxu1 %v783_v28  ;;  %v781_v18 = vpop.permute.xlu1 %780 }
 0x4fb   : > { %1217 = vmatpush3.msra.mxu1 %v783_v28 }
 0x4fc   : > { %1218 = vmatprep.subr.mxu1 %v781_v18 }
 0x4fd   : > { %v779_v29 = vpop.permute.xlu0 %778  ;;  %1219 = vmatpush3.msra.mxu1 %v781_v18 }
 0x4fe   : > { %1220 = vmatprep.subr.mxu1 %v779_v29  ;;  %v777_v19 = vpop.permute.xlu1 %776 }
 0x4ff   : > { %1221 = vmatpush3.msra.mxu1 %v779_v29 }
 0x500   : > { %1222 = vmatprep.subr.mxu1 %v777_v19 }
 0x501   : > { %v775_v30 = vpop.permute.xlu0 %774  ;;  %1223 = vmatpush3.msra.mxu1 %v777_v19 }
 0x502   : > { %1224 = vmatprep.subr.mxu1 %v775_v30  ;;  %v773_v20 = vpop.permute.xlu1 %772 }
 0x503   : > { %1225 = vmatpush3.msra.mxu1 %v775_v30 }
 0x504   : > { %1226 = vmatprep.subr.mxu1 %v773_v20 }
 0x505   : > { %1227 = vmatpush3.msra.mxu1 %v773_v20 }
 0x55e   : > { %v722_v31 = vpop.permute.xlu0 %721 }
 0x55f   : > { %728 = vst.msk [vmem:[#allocation2] sm:$0xff] %vm727_vm8, %v722_v31  ;;  %v724_v32 = vpop.permute.xlu1 %723 }
 0x560   : > { %729 = vst.msk [vmem:[#allocation2 + $0x8] sm:$0xff] %vm727_vm8, %v724_v32 }
 0x562   : > { %v771_v34 = vpop.permute.xlu0 %770 }
 0x563   : > { %1228 = vmatprep.subr.mxu1 %v771_v34  ;;  %v769_v35 = vpop.permute.xlu1 %768 }
 0x564   : > { %1229 = vmatpush3.msra.mxu1 %v771_v34 }
 0x565   : > { %1230 = vmatprep.subr.mxu1 %v769_v35 }
 0x566   : > { %v767_v36 = vpop.permute.xlu0 %766  ;;  %1231 = vmatpush3.msra.mxu1 %v769_v35  ;;  %v746_v37 = vld [vmem:[#allocation2] sm:$0xff] }
 0x567   : > { %1232 = vmatprep.subr.mxu1 %v767_v36  ;;  %1236 = vmatprep.mubr.f32.mxu1 %v746_v37  ;;  %v765_v39 = vpop.permute.xlu1 %764  ;;  %v747_v40 = vld [vmem:[#allocation2 + $0x8] sm:$0xff] }
 0x568   : > { %1233 = vmatpush3.msra.mxu1 %v767_v36 }
 0x569   : > { %1234 = vmatprep.subr.mxu1 %v765_v39 }
 0x56a   : > { %1235 = vmatpush3.msra.mxu1 %v765_v39 }
 0x56b   : > { %1237 = vmatmul.mubr.f32.vlgmr.msra.gmra.mxu1 %v747_v40 }
 0x62b   : > { %v1238_v41 = vpop.f32.mrf.mxu1 }
 0x62c   : > { %v902_v42 = vrot.slane %v1238_v41, 1  ;;  %v890_v44 = vrot.slane %v1238_v41, 7 }
 0x62d   : > { %v878_v43 = vpop.f32.mrf.mxu1 }
 0x62e   : > { %v889_v45 = vrot.slane %v878_v43, 7  ;;  %v901_v46 = vrot.slane %v878_v43, 1  ;;  %v906_v48 = vsel %vm294_vm2, %v902_v42, 0.0 }
 0x62f   : > { %v908_v50 = vsel %vm1547_vm4, %v906_v48, 0.0 }
 0x630   : > { %892 = vrot.lane.b32.xlu0 %v889_v45, %s1354_s17  ;;  %v891_v47 = vsel %vm281_vm3, %v889_v45, %v890_v44  ;;  %v903_v49 = vsel %vm294_vm2, %v901_v46, %v902_v42 }
 0x631   : > { %894 = vrot.lane.b32.xlu1 %v891_v47, %s1354_s17  ;;  %s1294_s17 = sshll.u32 %s1363_s16, 4  ;;  %s1295_s17 = int_to_ptr.vmem [resolvable:$false] %s1294_s17 }
 0x632   : > { %p1297_p0 = scmp.lt.s32.totalorder %s1705_s5, %s1295_s17 }
 0x634   : > { %913 = vrot.lane.b32.xlu0 %v903_v49, %s1355_s21 }
 0x635   : > { %915 = vrot.lane.b32.xlu1 %v908_v50, %s1355_s21  ;;  %s1296_s21 = scalar_lea.vmem %s1295_s17, 512 }
 0x636   : > { %p1298_p1 = scmp.lt.s32.totalorder %s1296_s21, %s1290_s13 }
 0x638   : > { %p1299_p2 = por %p1298_p1, %p1297_p0 }
 0x63a   : > { %p1300_p3 = pnand %p1299_p2, %p1293_p13 }
 0x6a2   : > { %v893_v51 = vpop.permute.xlu0 %892 }
 0x6a3   : > { %v898_v52 = vsel %vm281_vm3, 0.0, %v893_v51  ;;  %v895_v53 = vpop.permute.xlu1 %894 }
 0x6a4   : > { %v899_v54 = vsel %vm1581_vm5, %v898_v52, 0.0  ;;  %v910_v56 = vadd.f32 %v1238_v41, %v895_v53 }
 0x6a5   : > { %v909_v55 = vadd.f32 %v899_v54, %v878_v43 }
 0x6a6   : > { %v914_v57 = vpop.permute.xlu0 %913 }
 0x6a7   : > { %v919_v58 = vadd.f32 %v914_v57, %v909_v55  ;;  %v916_v59 = vpop.permute.xlu1 %915 }
 0x6a8   : > { %v920_v60 = vadd.f32 %v916_v59, %v910_v56 }
 0x6a9   : > { %923 = vrot.lane.b32.xlu0 %v919_v58, %s1362_s28 }
 0x6aa   : > { %925 = vrot.lane.b32.xlu1 %v920_v60, %s1362_s28 }
 0x71b   : > { %v924_v33 = vpop.permute.xlu0 %923 }
 0x71c   : > { %930 = vst.msk [vmem:[#allocation2] sm:$0xff] %vm929_vm9, %v924_v33  ;;  %v926_v61 = vpop.permute.xlu1 %925 }
 0x71d   : > { %931 = vst.msk [vmem:[#allocation2 + $0x8] sm:$0xff] %vm929_vm9, %v926_v61 }
 0x723   : > { %v932_v38 = vld [vmem:[#allocation2] sm:$0xff] }
 0x724   : > { %v933_v62 = vld [vmem:[#allocation2 + $0x8] sm:$0xff]  ;;  %v934_v63 = vmax.f32 %v932_v38, 0.0 }
 0x725   : > { %v935_v2 = vmax.f32 %v933_v62, 0.0 }
 0x726   : > { %936 = vst [vmem:[%s137_s4] sm:$0xff] %v934_v63 }
 0x727   : > { %937 = vst [vmem:[%s137_s4 + $0x8] sm:$0xff] %v935_v2 }
 0x728   : > { %1303 = shalt.err (!%p1300_p3)
}
 0x729   : > { %s1304_s22 = scalar_lea.hbm %s1703_s8, 256  ;;  %s1308_s26 = scalar_lea.hbm %s1750_s2, 512 }
 0x72a   : > { %p1305_p4 = scmp.ne.s32.totalorder %s1703_s8, %s1304_s22  ;;  %p1309_p9 = scmp.lt.s32.totalorder %s1703_s8, %s1750_s2 }
 0x72b   : > { %p1310_p10 = scmp.lt.s32.totalorder %s1308_s26, %s1304_s22 }
 0x72c   : > { %p1306_p7 = pnand %p1305_p4, %p1418_p5 }
 0x72d   : > { %p1311_p11 = por %p1310_p10, %p1309_p9 }
 0x72e   : > { %p1307_p8 = pneg %p1306_p7 }
 0x730   : > { %p1312_p12 = pnand %p1311_p11, %p1307_p8 }
 0x732   : > { %1315 = shalt.err (!%p1312_p12)
}
 0x733   : > { %s1364_s29 = smov 128  }
 0x734   : > { %1239 = dma.vmem_to_hbm [thread:$0]  (%p1418_p5), %s1705_s5, 256, %s1703_s8, %s1707_s14, %s1364_s29, %s1364_s29, %s1359_s25  }
 0x735 PF: > { %p1245_p13 = scmp.ge.s32.totalorder %s1350_s12, 2  ;;  %s967_s30 = sand.u32 1, %s1338_s9  }
 0x736   : > { %s968_s3 = scalar_lea.sflag [#allocation4], %s967_s30 }
 0x737   : > { %p1242_p0 = pnand %p1245_p13, %p1422_p6 }
 0x739   : > { %p1243_p1 = pneg %p1242_p0 }
 0x73b   : > { %1333 = dma.done.wait (%p1243_p1), %s968_s3, 256  }
 0x73c   : > { %1335 = vsyncadd (%p1243_p1), %s968_s3, 4294967040  ;;  %p12_p2 = scmp.ge.s32.totalorder %s1405_s15, 4   ;;  %s1757_s9 = smov %s1342_s10 }
 0x73d   : > { %s1758_s10 = smov %s1346_s11  ;;  %s1759_s11 = smov %s1416_s18 }
 0x73e   : > { %s1760_s12 = smov %s1405_s15  ;;  %14 = sbr.rel (!%p12_p2) target bundleno = 3 (0x3), region = 63 }
 0x743   :  { %973 = vsyncpa [#allocation4], 1 }
 0x744   :  { %975 = vsyncpa [#allocation4 + $0x1], 1 }

</bundles_post_ra>
